<compile_context>
chip_gen: v6e
topology: v6e:2x2x1
jax: 0.10.0
libtpu: 0.0.40
codegen_flags: <defaults>
</compile_context>

<pallas_src>
import functools
import math

import jax
import jax.numpy as jnp
from jax import lax
from jax.experimental import pallas as pl
from jax.experimental.pallas import tpu as pltpu


def attention_kernel(q_ref, c_ref, w_in_ref, w_a_ref, w_bs_ref, out_ref, wts_ref,
                     *, scale):
    Bb, TL, D = q_ref.shape
    L_q = c_ref.shape[1]
    cdt = c_ref.dtype  # MXU input dtype (bf16 by default, f32 for the exact path)

    q = q_ref[...]          # (Bb, TL, D)
    c = c_ref[...]          # (Bb, L_q, D)
    w_in = w_in_ref[...]    # (D, D)   linear_in.weight
    w_a = w_a_ref[...]      # (D, D)   linear_out.weight[:, :D]        (acts on mix)
    w_bs = w_bs_ref[...]    # (D, D)   linear_out.weight[:, D:]/scale  (acts on scaled q_proj)

    # Contract the last dim of both operands (== x @ W.T) -- no XLU transposes.
    cdims = (((1,), (1,)), ((), ()))

    # --- linear_in: fold batch into the MXU M dimension ---------------------
    q2d = q.reshape(Bb * TL, D)
    q_proj = lax.dot_general(q2d, w_in, cdims,
                             preferred_element_type=jnp.float32)   # (Bb*TL, D) f32

    # Single MXU-dtype copy of q_proj with the softmax scale folded in.
    # (The w_bs weight half was pre-divided by `scale` in the wrapper, so the
    #  output-projection contribution is unchanged.)
    q_s = (q_proj * scale).astype(cdt)                             # (Bb*TL, D)
    q_s3 = q_s.reshape(Bb, TL, D)

    # --- scaled dot-product scores: contract D directly (no context.T) ------
    scores = jnp.einsum("bqd,bkd->bqk", q_s3, c,
                        preferred_element_type=jnp.float32)        # (Bb, TL, L_q) f32

    # --- exact softmax over L_q (weights are a kernel output) ---------------
    m = jnp.max(scores, axis=-1, keepdims=True)
    e = jnp.exp(scores - m)
    denom = jnp.sum(e, axis=-1, keepdims=True)
    weights = e / denom                                            # (Bb, TL, L_q) f32

    # --- mix = weights @ context ---------------------------------------------
    mix = jnp.einsum("bqk,bkd->bqd", weights.astype(cdt), c,
                     preferred_element_type=jnp.float32)           # (Bb, TL, D) f32

    # --- linear_out without the concat: two matmuls into one f32 accumulator -
    mix2d = mix.reshape(Bb * TL, D).astype(cdt)
    out2d = lax.dot_general(mix2d, w_a, cdims, preferred_element_type=jnp.float32)
    out2d = out2d + lax.dot_general(q_s, w_bs, cdims,
                                    preferred_element_type=jnp.float32)
    out = jnp.tanh(out2d)                                          # (Bb*TL, D) f32

    out_ref[...] = out.reshape(Bb, TL, D).astype(out_ref.dtype)
    wts_ref[...] = weights.astype(wts_ref.dtype)


def _vmem_capacity_bytes():
    """Per-TensorCore VMEM capacity; conservative fallback if unqueryable."""
    try:
        info = pltpu.get_tpu_info()
        cap = getattr(info, "vmem_capacity_bytes", None)
        if cap:
            return int(cap)
    except Exception:
        pass
    return 64 * 1024 * 1024   # v7x per-TC VMEM (smallest current generation)


def _choose_tiles(B, L_out, L_q, D, in_itemsize, wts_itemsize, budget):
    """Pick (batch block Bb, L_out tile TL) under a VMEM budget.

    TL is a sublane-aligned (multiple-of-8) divisor of L_out so reshapes stay
    zero-copy views; Bb is the largest divisor of B whose per-step footprint
    (double-buffered in/out blocks + resident weights + live f32 temporaries)
    fits the budget.  The grid is kept at >= 2 steps when B >= 2 so both v7x
    TensorCores receive work along a "parallel" axis.
    """
    tl = L_out
    for cand in (512, 384, 256, 128, 64, 32, 16, 8):
        if cand <= L_out and L_out % cand == 0:
            tl = cand
            break

    def vmem_estimate(bb):
        dbuf_in = 2 * (bb * tl * D + bb * L_q * D) * in_itemsize        # q + context, double-buffered
        dbuf_w = 2 * 3 * D * D * in_itemsize                            # 3 resident weight tiles
        dbuf_out = 2 * (bb * tl * D * 4 + bb * tl * L_q * wts_itemsize) # out + weights, double-buffered
        live = (4 * bb * tl * D + 4 * bb * tl * L_q) * 4                # f32 intermediates
        return dbuf_in + dbuf_w + dbuf_out + live

    bb = B
    while bb > 1 and (B % bb != 0 or vmem_estimate(bb) > budget):
        bb -= 1

    # v7x has 2 TensorCores: keep >= 2 grid steps on a "parallel" axis.
    if (B // bb) * (L_out // tl) < 2 and B >= 2:
        bb = max(d for d in range(1, B) if B % d == 0 and d <= B // 2)

    return bb, tl


def attention_pallas(query, context, w_in, w_out, *,
                     mxu_dtype=jnp.bfloat16, weights_dtype=None):
    B, L_out, D = query.shape
    _, L_q, _ = context.shape
    scale = 1.0 / math.sqrt(D)

    # bf16 weights writeback by default (largest HBM term when L_q > D).
    if weights_dtype is None:
        weights_dtype = mxu_dtype

    in_itemsize = jnp.dtype(mxu_dtype).itemsize
    wts_itemsize = jnp.dtype(weights_dtype).itemsize

    cap = _vmem_capacity_bytes()
    budget = int(cap * 0.55)                                # tiling budget with headroom
    vmem_limit = max(32 * 1024 * 1024,
                     min(int(cap * 0.85), 110 * 1024 * 1024))

    Bb, TL = _choose_tiles(B, L_out, L_q, D, in_itemsize, wts_itemsize, budget)

    # Split linear_out.weight once in the wrapper -> no in-kernel concat.
    # The q_proj half is pre-divided by `scale` so the kernel can fold the
    # softmax scale into its single MXU-dtype copy of q_proj.
    w_a = w_out[:, :D]
    w_bs = w_out[:, D:] * jnp.asarray(1.0 / scale, w_out.dtype)

    # Cast MXU operands once outside the kernel (halves weight DMA when bf16).
    qx = query.astype(mxu_dtype)
    cx = context.astype(mxu_dtype)
    w_inx = w_in.astype(mxu_dtype)
    w_ax = w_a.astype(mxu_dtype)
    w_bsx = w_bs.astype(mxu_dtype)

    kernel = functools.partial(attention_kernel, scale=scale)

    grid = (B // Bb, L_out // TL)
    grid_spec = pltpu.PrefetchScalarGridSpec(
        num_scalar_prefetch=0,
        grid=grid,
        in_specs=[
            pl.BlockSpec((Bb, TL, D), lambda b, l: (b, l, 0)),    # query tile
            pl.BlockSpec((Bb, L_q, D), lambda b, l: (b, 0, 0)),   # full context per batch block
            pl.BlockSpec((D, D), lambda b, l: (0, 0)),            # w_in        (grid-invariant)
            pl.BlockSpec((D, D), lambda b, l: (0, 0)),            # w_out[:, :D]
            pl.BlockSpec((D, D), lambda b, l: (0, 0)),            # w_out[:, D:] / scale
        ],
        out_specs=[
            pl.BlockSpec((Bb, TL, D), lambda b, l: (b, l, 0)),
            pl.BlockSpec((Bb, TL, L_q), lambda b, l: (b, l, 0)),
        ],
    )

    out_shapes = (
        jax.ShapeDtypeStruct((B, L_out, D), jnp.float32),
        jax.ShapeDtypeStruct((B, L_out, L_q), weights_dtype),
    )

    return pl.pallas_call(
        kernel,
        out_shape=out_shapes,
        grid_spec=grid_spec,
        compiler_params=pltpu.CompilerParams(
            dimension_semantics=("parallel", "parallel"),
            vmem_limit_bytes=vmem_limit,
        ),
    )(qx, cx, w_inx, w_ax, w_bsx)


def attention_reference(query, context, w_in, w_out):
    """Pure-JAX reference mirroring the PyTorch forward ('general' type)."""
    D = query.shape[-1]
    scale = 1.0 / math.sqrt(D)
    hp = jax.lax.Precision.HIGHEST
    q_proj = jnp.einsum("bld,ed->ble", query, w_in, precision=hp)
    scores = jnp.einsum("bld,bkd->blk", q_proj, context, precision=hp) * scale
    weights = jax.nn.softmax(scores, axis=-1)
    mix = jnp.einsum("blk,bkd->bld", weights, context, precision=hp)
    combined = jnp.concatenate([mix, q_proj], axis=-1)
    out = jnp.tanh(jnp.einsum("blc,dc->bld", combined, w_out, precision=hp))
    return out, weights


if __name__ == "__main__":
    B, L_OUT, L_Q, D = 2, 8, 8, 32

    key = jax.random.PRNGKey(0)
    k_q, k_c, k_win, k_wout = jax.random.split(key, 4)

    query = jax.random.normal(k_q, (B, L_OUT, D), dtype=jnp.float32)
    context = jax.random.normal(k_c, (B, L_Q, D), dtype=jnp.float32)
    # Deterministic parameter init matching nn.Linear weight shapes.
    w_in = jax.random.normal(k_win, (D, D), dtype=jnp.float32) * (1.0 / math.sqrt(D))
    w_out = jax.random.normal(k_wout, (D, 2 * D), dtype=jnp.float32) * (1.0 / math.sqrt(2 * D))

    ref_out, ref_wts = attention_reference(query, context, w_in, w_out)

    # f32 MXU path with f32 weights output (closest to the PyTorch module).
    # Tolerance accommodates default-precision (bf16-pass) dots that appear if
    # this script runs under TPU interpret mode instead of Mosaic.
    out32, wts32 = attention_pallas(query, context, w_in, w_out,
                                    mxu_dtype=jnp.float32,
                                    weights_dtype=jnp.float32)
    jax.block_until_ready((out32, wts32))
    assert out32.shape == (B, L_OUT, D)
    assert wts32.shape == (B, L_OUT, L_Q)
    assert jnp.allclose(out32, ref_out, atol=5e-2, rtol=5e-2), "f32 path: output mismatch"
    assert jnp.allclose(wts32, ref_wts, atol=5e-2, rtol=5e-2), "f32 path: weights mismatch"

    # Default fast path: bf16 MXU inputs, bf16 weights writeback, f32 accumulation.
    out, wts = attention_pallas(query, context, w_in, w_out)
    jax.block_until_ready((out, wts))
    assert out.shape == (B, L_OUT, D)
    assert wts.shape == (B, L_OUT, L_Q)
    assert jnp.allclose(out.astype(jnp.float32), ref_out, atol=1e-1, rtol=1e-1), \
        "bf16 path: output mismatch"
    assert jnp.allclose(wts.astype(jnp.float32), ref_wts, atol=1e-1, rtol=1e-1), \
        "bf16 path: weights mismatch"

    print("KERNEL_OK")
</pallas_src>

<mosaic_0001>
module attributes {stable_mosaic.version = 11 : i64} {
  func.func @attention_kernel(%arg0: i32, %arg1: i32, %arg2: memref<1x8x32xf32, #tpu.memory_space<vmem>>, %arg3: memref<1x8x32xf32, #tpu.memory_space<vmem>>, %arg4: memref<32x32xf32, #tpu.memory_space<vmem>>, %arg5: memref<32x32xf32, #tpu.memory_space<vmem>>, %arg6: memref<32x32xf32, #tpu.memory_space<vmem>>, %arg7: memref<1x8x32xf32, #tpu.memory_space<vmem>>, %arg8: memref<1x8x8xf32, #tpu.memory_space<vmem>>) attributes {dimension_semantics = [#tpu.dimension_semantics<parallel>, #tpu.dimension_semantics<parallel>], iteration_bounds = array<i64: 2, 1>, scalar_prefetch = 0 : i64, scratch_operands = 0 : i64, tpu.core_type = #tpu.core_type<tc>, window_params = [{transform_indices = @transform_0, window_bounds = array<i64: 1, 8, 32>}, {transform_indices = @transform_1, window_bounds = array<i64: 1, 8, 32>}, {pipeline_mode = #tpu.pipeline_mode<synchronous>, transform_indices = @transform_2, window_bounds = array<i64: 32, 32>}, {pipeline_mode = #tpu.pipeline_mode<synchronous>, transform_indices = @transform_3, window_bounds = array<i64: 32, 32>}, {pipeline_mode = #tpu.pipeline_mode<synchronous>, transform_indices = @transform_4, window_bounds = array<i64: 32, 32>}, {transform_indices = @transform_5, window_bounds = array<i64: 1, 8, 32>}, {transform_indices = @transform_6, window_bounds = array<i64: 1, 8, 8>}]} {
    %c0 = arith.constant 0 : index
    %c0_0 = arith.constant 0 : index
    %c0_1 = arith.constant 0 : index
    %0 = vector.load %arg2[%c0, %c0_0, %c0_1] : memref<1x8x32xf32, #tpu.memory_space<vmem>>, vector<1x8x32xf32>
    %c0_2 = arith.constant 0 : index
    %c0_3 = arith.constant 0 : index
    %c0_4 = arith.constant 0 : index
    %1 = vector.load %arg3[%c0_2, %c0_3, %c0_4] : memref<1x8x32xf32, #tpu.memory_space<vmem>>, vector<1x8x32xf32>
    %c0_5 = arith.constant 0 : index
    %c0_6 = arith.constant 0 : index
    %2 = vector.load %arg4[%c0_5, %c0_6] : memref<32x32xf32, #tpu.memory_space<vmem>>, vector<32x32xf32>
    %c0_7 = arith.constant 0 : index
    %c0_8 = arith.constant 0 : index
    %3 = vector.load %arg5[%c0_7, %c0_8] : memref<32x32xf32, #tpu.memory_space<vmem>>, vector<32x32xf32>
    %c0_9 = arith.constant 0 : index
    %c0_10 = arith.constant 0 : index
    %4 = vector.load %arg6[%c0_9, %c0_10] : memref<32x32xf32, #tpu.memory_space<vmem>>, vector<32x32xf32>
    %5 = vector.shape_cast %0 : vector<1x8x32xf32> to vector<8x32xf32>
    %cst = arith.constant dense<0.000000e+00> : vector<8x32xf32>
    %6 = tpu.matmul %5, %2, %cst {dimension_numbers = #tpu.dot_dimension_numbers<[1], [1], [0], [0], [0, 0, 1, 0], [], []>} : vector<8x32xf32>, vector<32x32xf32>, vector<8x32xf32> -> vector<8x32xf32>
    %cst_11 = arith.constant 0.176776692 : f32
    %7 = vector.broadcast %cst_11 : f32 to vector<8x32xf32>
    %8 = arith.mulf %6, %7 : vector<8x32xf32>
    %9 = vector.shape_cast %8 : vector<8x32xf32> to vector<1x8x32xf32>
    "tpu.trace_start"() <{level = 10 : i32, message = "bqd,bkd->bqk"}> : () -> ()
    %cst_12 = arith.constant dense<0.000000e+00> : vector<1x8x8xf32>
    %10 = tpu.matmul %9, %1, %cst_12 {dimension_numbers = #tpu.dot_dimension_numbers<[2], [2], [1], [1], [0, 0, 0, 1, 1, 1], [0], [0]>} : vector<1x8x32xf32>, vector<1x8x32xf32>, vector<1x8x8xf32> -> vector<1x8x8xf32>
    "tpu.trace_stop"() : () -> ()
    %cst_13 = arith.constant dense<0xFF800000> : vector<1x8xf32>
    %11 = vector.multi_reduction <maximumf>, %10, %cst_13 [2] : vector<1x8x8xf32> to vector<1x8xf32>
    %12 = vector.shape_cast %11 : vector<1x8xf32> to vector<1x8x1xf32>
    %13 = vector.broadcast %12 : vector<1x8x1xf32> to vector<1x8x8xf32>
    %14 = arith.subf %10, %13 : vector<1x8x8xf32>
    %15 = math.exp %14 : vector<1x8x8xf32>
    %cst_14 = arith.constant dense<0.000000e+00> : vector<1x8xf32>
    %16 = vector.multi_reduction <add>, %15, %cst_14 [2] : vector<1x8x8xf32> to vector<1x8xf32>
    %17 = vector.shape_cast %16 : vector<1x8xf32> to vector<1x8x1xf32>
    %18 = vector.broadcast %17 : vector<1x8x1xf32> to vector<1x8x8xf32>
    %19 = arith.divf %15, %18 : vector<1x8x8xf32>
    "tpu.trace_start"() <{level = 10 : i32, message = "bqk,bkd->bqd"}> : () -> ()
    %cst_15 = arith.constant dense<0.000000e+00> : vector<1x8x32xf32>
    %20 = tpu.matmul %19, %1, %cst_15 {dimension_numbers = #tpu.dot_dimension_numbers<[2], [1], [1], [2], [0, 0, 0, 1, 1, 2], [0], [0]>} : vector<1x8x8xf32>, vector<1x8x32xf32>, vector<1x8x32xf32> -> vector<1x8x32xf32>
    "tpu.trace_stop"() : () -> ()
    %21 = vector.shape_cast %20 : vector<1x8x32xf32> to vector<8x32xf32>
    %cst_16 = arith.constant dense<0.000000e+00> : vector<8x32xf32>
    %22 = tpu.matmul %21, %3, %cst_16 {dimension_numbers = #tpu.dot_dimension_numbers<[1], [1], [0], [0], [0, 0, 1, 0], [], []>} : vector<8x32xf32>, vector<32x32xf32>, vector<8x32xf32> -> vector<8x32xf32>
    %cst_17 = arith.constant dense<0.000000e+00> : vector<8x32xf32>
    %23 = tpu.matmul %8, %4, %cst_17 {dimension_numbers = #tpu.dot_dimension_numbers<[1], [1], [0], [0], [0, 0, 1, 0], [], []>} : vector<8x32xf32>, vector<32x32xf32>, vector<8x32xf32> -> vector<8x32xf32>
    %24 = arith.addf %22, %23 : vector<8x32xf32>
    %25 = math.tanh %24 : vector<8x32xf32>
    %26 = vector.shape_cast %25 : vector<8x32xf32> to vector<1x8x32xf32>
    %c0_18 = arith.constant 0 : index
    %c0_19 = arith.constant 0 : index
    %c0_20 = arith.constant 0 : index
    %27 = vector.load %arg7[%c0_18, %c0_19, %c0_20] : memref<1x8x32xf32, #tpu.memory_space<vmem>>, vector<1x8x32xf32>
    tpu.vector_store %arg7[%c0_18, %c0_19, %c0_20], %26 {strides = array<i32>} : memref<1x8x32xf32, #tpu.memory_space<vmem>>, vector<1x8x32xf32>,
    %c0_21 = arith.constant 0 : index
    %c0_22 = arith.constant 0 : index
    %c0_23 = arith.constant 0 : index
    %28 = vector.load %arg8[%c0_21, %c0_22, %c0_23] : memref<1x8x8xf32, #tpu.memory_space<vmem>>, vector<1x8x8xf32>
    tpu.vector_store %arg8[%c0_21, %c0_22, %c0_23], %19 {strides = array<i32>} : memref<1x8x8xf32, #tpu.memory_space<vmem>>, vector<1x8x8xf32>,
    return
  }
  func.func @transform_0(%arg0: i32, %arg1: i32) -> (i32, i32, i32) {
    %c0_i32 = arith.constant 0 : i32
    %c0_i32_0 = arith.constant 0 : i32
    return %arg0, %arg1, %c0_i32 : i32, i32, i32
  }
  func.func @transform_1(%arg0: i32, %arg1: i32) -> (i32, i32, i32) {
    %c0_i32 = arith.constant 0 : i32
    %c0_i32_0 = arith.constant 0 : i32
    %c0_i32_1 = arith.constant 0 : i32
    return %arg0, %c0_i32, %c0_i32_0 : i32, i32, i32
  }
  func.func @transform_2(%arg0: i32, %arg1: i32) -> (i32, i32) {
    %c0_i32 = arith.constant 0 : i32
    %c0_i32_0 = arith.constant 0 : i32
    %c0_i32_1 = arith.constant 0 : i32
    return %c0_i32, %c0_i32_0 : i32, i32
  }
  func.func @transform_3(%arg0: i32, %arg1: i32) -> (i32, i32) {
    %c0_i32 = arith.constant 0 : i32
    %c0_i32_0 = arith.constant 0 : i32
    %c0_i32_1 = arith.constant 0 : i32
    return %c0_i32, %c0_i32_0 : i32, i32
  }
  func.func @transform_4(%arg0: i32, %arg1: i32) -> (i32, i32) {
    %c0_i32 = arith.constant 0 : i32
    %c0_i32_0 = arith.constant 0 : i32
    %c0_i32_1 = arith.constant 0 : i32
    return %c0_i32, %c0_i32_0 : i32, i32
  }
  func.func @transform_5(%arg0: i32, %arg1: i32) -> (i32, i32, i32) {
    %c0_i32 = arith.constant 0 : i32
    %c0_i32_0 = arith.constant 0 : i32
    return %arg0, %arg1, %c0_i32 : i32, i32, i32
  }
  func.func @transform_6(%arg0: i32, %arg1: i32) -> (i32, i32, i32) {
    %c0_i32 = arith.constant 0 : i32
    %c0_i32_0 = arith.constant 0 : i32
    return %arg0, %arg1, %c0_i32 : i32, i32, i32
  }
}

</mosaic_0001>

<bundles_post_ra>
// kernel: tpu_custom_call.1
= control target key start
LH: loop header
LB: loop body
LE: loop exit
PB: predicated region body
PF: predicated region fallthrough
CT: control target
= control target key end

     0   :  { %s1809_s0 = inlined_call_operand.hbm [shape: f32[2,8,32], index: 0, kind: input, shape index: {}]   ;;  %s1810_s1 = inlined_call_operand.hbm [shape: f32[2,8,32], index: 1, kind: input, shape index: {}]   ;;  %s1811_s2 = inlined_call_operand.hbm [shape: f32[32,32], index: 2, kind: input, shape index: {}]   ;;  %s1812_s3 = inlined_call_operand.hbm [shape: f32[32,32], index: 3, kind: input, shape index: {}]   ;;  %s1813_s4 = inlined_call_operand.hbm [shape: f32[32,32], index: 4, kind: input, shape index: {}]   ;;  %s1814_s5 = inlined_call_operand.hbm [shape: f32[2,8,32], index: 5, kind: output, shape index: {0}]   ;;  %s1815_s6 = inlined_call_operand.hbm [shape: f32[2,8,8], index: 6, kind: output, shape index: {1}]  }
   0x1   :  { %1818 = sst [smem:[#allocation20_spill]] %s1809_s0 }
   0x2   :  { %1819 = sst [smem:[#allocation21_spill]] %s1811_s2 }
   0x3   :  { %1820 = sst [smem:[#allocation22_spill]] %s1812_s3 }
   0x4   :  { %1821 = sst [smem:[#allocation23_spill]] %s1813_s4 }
   0x5   :  { %12 = vsyncpa [#allocation3], 0 }
   0x6   :  { %14 = vsyncpa [#allocation3 + $0x1], 0 }
   0x7   :  { %15 = vsyncpa [#allocation6], 0 }
   0x8   :  { %17 = vsyncpa [#allocation6 + $0x1], 0 }
   0x9   :  { %18 = vsyncpa [#allocation9], 0 }
   0xa   :  { %19 = vsyncpa [#allocation4], 0 }
   0xb   :  { %21 = vsyncpa [#allocation4 + $0x1], 0 }
   0xc   :  { %22 = vsyncpa [#allocation13], 0 }
   0xd   :  { %24 = vsyncpa [#allocation13 + $0x1], 0  ;;  %s1529_s21 = smov 0   ;;  %s1531_s22 = smov 0  }
   0xe   :  { %s1533_s23 = smov 0   ;;  %s1535_s24 = smov 0  }
   0xf   :  { %s1537_s25 = smov 0   ;;  %s1539_s26 = smov 0  }
  0x10 LB: > { %s1560_s27 = sadd.s32 4294967295, %s1481_s26   ;;  %s1008_s28 = sadd.s32 4294967294, %s1481_s26   ;;  %s1481_s26 = sphi %s1539_s26, %s30_s26   ;;  %s1477_s25 = sphi %s1537_s25, %s1844_s25   ;;  %s1473_s24 = sphi %s1535_s24, %s1843_s24   ;;  %s1469_s23 = sphi %s1533_s23, %s1842_s23   ;;  %s1465_s22 = sphi %s1531_s22, %s1841_s22   ;;  %s1461_s21 = sphi %s1529_s21, %s1840_s21  }
  0x11   : > { %p64_p0 = scmp.ne.s32.totalorder %s1465_s22, %s1461_s21  ;;  %p1816_p1 = scmp.eq.s32.totalorder %s1560_s27, 0 }
  0x12   : > { %p185_p3 = scmp.eq.s32.totalorder %s1008_s28, 1  ;;  %p1009_p5 = scmp.ge.s32.totalorder %s1481_s26, 1 }
  0x13   : > { %p1569_p4 = por %p1816_p1, %p64_p0  ;;  %p220_p7 = scmp.lt.s32.totalorder %s1481_s26, 3 }
  0x14   : > { %p1574_p6 = por %p185_p3, %p64_p0  ;;  %s1483_s8 = smov [#allocation7]  }
  0x15   : > { %s1822_s29 = scalar_select %p1569_p4, 1, 0 }
  0x16   : > { %s1823_s30 = scalar_select %p1574_p6, 1, 0 }
  0x17   : > { %p1579_p8 = pnand %p1009_p5, %p220_p7  ;;  %s232_s9 = sshll.u32 %s1483_s8, 4  ;;  %s233_s9 = int_to_ptr.vmem [resolvable:$true] %s232_s9 }
  0x18   : > { %s1484_s11 = smov [#allocation8]   ;;  %s1485_s13 = smov [#allocation10]  }
  0x19   : > { %p1132_p9 = pneg %p1579_p8  ;;  %s245_s12 = sshll.u32 %s1484_s11, 4  ;;  %s246_s12 = int_to_ptr.vmem [resolvable:$true] %s245_s12 }
  0x1a   : > { %s258_s14 = sshll.u32 %s1485_s13, 4  ;;  %s1236_s15 = scalar_lea.vmem %s233_s9, 512  ;;  %s259_s14 = int_to_ptr.vmem [resolvable:$true] %s258_s14 }
  0x1b   : > { %p1588_p11 = pnand %p1132_p9, %p1816_p1  ;;  %p1237_p13 = scmp.ne.s32.totalorder %s233_s9, %s1236_s15 }
  0x1c   : > { %p1244_p5 = scmp.lt.s32.totalorder %s233_s9, %s233_s9  ;;  %p1245_p7 = scmp.lt.s32.totalorder %s1236_s15, %s1236_s15 }
  0x1d   : > { %p1227_p12 = pneg %p1588_p11 }
  0x1e   : > { %p1246_p9 = por %p1245_p7, %p1244_p5 }
  0x1f   : > { %p1239_p0 = pnand %p1237_p13, %p1227_p12 }
  0x21   : > { %p1240_p3 = pneg %p1239_p0 }
  0x23   : > { %p1247_p10 = pnand %p1246_p9, %p1240_p3 }
  0x25   : > { %1250 = shalt.err (!%p1247_p10)
}
  0x26   : > { %s1486_s16 = smov 128   ;;  %s1487_s17 = smov 8  }
  0x27   : > { %s1826_s2 = sld [smem:[#allocation21_spill]]  ;;  %s1262_s20 = scalar_lea.vmem %s246_s12, 512 }
  0x28   : > { %p1263_p1 = scmp.ne.s32.totalorder %s246_s12, %s1262_s20  ;;  %p1270_p2 = scmp.lt.s32.totalorder %s246_s12, %s246_s12 }
  0x29   : > { %p1271_p6 = scmp.lt.s32.totalorder %s1262_s20, %s1262_s20 }
  0x2a   : > { %p1265_p13 = pnand %p1263_p1, %p1227_p12 }
  0x2b   : > { %p1272_p5 = por %p1271_p6, %p1270_p2 }
  0x2c   : > { %p1266_p0 = pneg %p1265_p13 }
  0x2d   : > { %1135 = dma.hbm_to_vmem [thread:$0]  (!%p1588_p11), %s1826_s2, 512, %s233_s9, [#allocation6], %s1486_s16, %s1486_s16, %s1487_s17  }
  0x2e   : > { %p1273_p3 = pnand %p1272_p5, %p1266_p0 }
  0x30   : > { %1276 = shalt.err (!%p1273_p3)
}
  0x31   : > { %s1827_s3 = sld [smem:[#allocation22_spill]]  ;;  %s1288_s9 = scalar_lea.vmem %s259_s14, 512 }
  0x32   : > { %p1289_p10 = scmp.ne.s32.totalorder %s259_s14, %s1288_s9  ;;  %p1296_p9 = scmp.lt.s32.totalorder %s259_s14, %s259_s14 }
  0x33   : > { %p1297_p13 = scmp.lt.s32.totalorder %s1288_s9, %s1288_s9 }
  0x34   : > { %p1291_p7 = pnand %p1289_p10, %p1227_p12 }
  0x35   : > { %p1298_p4 = por %p1297_p13, %p1296_p9 }
  0x36   : > { %p1292_p1 = pneg %p1291_p7 }
  0x37   : > { %1138 = dma.hbm_to_vmem [thread:$0]  (!%p1588_p11), %s1827_s3, 512, %s246_s12, [#allocation9], %s1486_s16, %s1486_s16, %s1487_s17  }
  0x38   : > { %p1299_p2 = pnand %p1298_p4, %p1292_p1 }
  0x3a   : > { %1302 = shalt.err (!%p1299_p2)
}
  0x3b   : > { %s1828_s4 = sld [smem:[#allocation23_spill]]  ;;  %s51_s12 = sadd.s32 1, %s1469_s23 }
  0x3c   : > { %s42_s15 = sadd.s32 1, %s1477_s25  ;;  %p58_p4 = scmp.ne.s32.totalorder %s1469_s23, %s1465_s22 }
  0x3d   : > { %p44_p6 = scmp.ge.s32.totalorder %s42_s15, 2  ;;  %p59_p12 = scmp.eq.s32.totalorder %s1481_s26, 0 }
  0x3e   : > { %p1829_p0 = scmp.eq.s32.totalorder %s1560_s27, 1  ;;  %p1159_p3 = scmp.lt.s32.totalorder %s1481_s26, 2 }
  0x3f   : > { %s1846_s15 = smov (%p44_p6, %s42_s15), 0  ;;  %p60_p10 = por %p59_p12, %p58_p4 }
  0x40   : > { %p1625_p5 = por %p1829_p0, %p58_p4  ;;  %s272_s18 = sand.u32 1, %s1469_s23  }
  0x41   : > { %1141 = dma.hbm_to_vmem [thread:$0]  (!%p1588_p11), %s1828_s4, 512, %s259_s14, [#allocation9], %s1486_s16, %s1486_s16, %s1487_s17  }
  0x42   : > { %s46_s19 = ssub.s32 %s1477_s25, %s1846_s15  ;;  %s1014_s14 = sshll.u32 %s272_s18, 3 }
  0x43   : > { %p49_p11 = scmp.eq.s32.totalorder %s46_s19, 0  ;;  %s1015_s16 = sshll.u32 %s1477_s25, 7 }
  0x44   : > { %s1831_s0 = sld [smem:[#allocation20_spill]]  ;;  %s276_s9 = scalar_lea.vmem [#allocation2], %s1014_s14 }
  0x45   : > { %s1637_s17 = scalar_select %p49_p11, %s1469_s23, %s51_s12  }
  0x46   : > { %s284_s11 = sshll.u32 %s276_s9, 4  ;;  %p1644_p7 = pnand %p1159_p3, %p60_p10  ;;  %s285_s11 = int_to_ptr.vmem [resolvable:$true] %s284_s11 }
  0x47   : > { %s1651_s19 = scalar_lea.hbm %s1810_s1, %s1015_s16  ;;  %s291_s12 = sand.u32 1, %s1481_s26  }
  0x48   : > { %s273_s4 = scalar_lea.sflag [#allocation3], %s272_s18  ;;  %p1305_p1 = pneg %p1644_p7 }
  0x49   : > { %s1316_s20 = scalar_lea.vmem %s285_s11, 128  ;;  %s1488_s28 = smov [#allocation2]  }
  0x4a   : > { %s282_s8 = scalar_lea.hbm %s1831_s0, %s1015_s16  ;;  %p1317_p9 = scmp.ne.s32.totalorder %s285_s11, %s1316_s20 }
  0x4b   : > { %s1321_s9 = sshll.u32 %s1488_s28, 4  ;;  %s1322_s9 = int_to_ptr.vmem [resolvable:$false] %s1321_s9 }
  0x4c   : > { %p1319_p13 = pnand %p1317_p9, %p1305_p1  ;;  %s1323_s0 = scalar_lea.vmem %s1322_s9, 256 }
  0x4d   : > { %p1324_p4 = scmp.lt.s32.totalorder %s285_s11, %s1322_s9  ;;  %p1325_p6 = scmp.lt.s32.totalorder %s1323_s0, %s1316_s20 }
  0x4e   : > { %p1320_p2 = pneg %p1319_p13 }
  0x4f   : > { %p1326_p12 = por %p1325_p6, %p1324_p4 }
  0x51   : > { %p1327_p0 = pnand %p1326_p12, %p1320_p2 }
  0x53   : > { %1330 = shalt.err (!%p1327_p0)
}
  0x54   : > { %1145 = dma.hbm_to_vmem [thread:$0]  (!%p1644_p7), %s282_s8, 128, %s285_s11, %s273_s4  }
  0x55   : > { %s295_s2 = scalar_lea.vmem [#allocation5], %s1014_s14  ;;  %s292_s18 = scalar_lea.sflag [#allocation6], %s291_s12 }
  0x56   : > { %s302_s3 = sshll.u32 %s295_s2, 4  ;;  %s1489_s28 = smov [#allocation5]   ;;  %s303_s3 = int_to_ptr.vmem [resolvable:$true] %s302_s3 }
  0x57   : > { %s1344_s16 = scalar_lea.vmem %s303_s3, 128  ;;  %s1349_s9 = sshll.u32 %s1489_s28, 4  ;;  %s1350_s9 = int_to_ptr.vmem [resolvable:$false] %s1349_s9 }
  0x58   : > { %p1345_p3 = scmp.ne.s32.totalorder %s303_s3, %s1344_s16  ;;  %s1351_s0 = scalar_lea.vmem %s1350_s9, 256 }
  0x59   : > { %p1352_p9 = scmp.lt.s32.totalorder %s303_s3, %s1350_s9  ;;  %p1353_p13 = scmp.lt.s32.totalorder %s1351_s0, %s1344_s16 }
  0x5a   : > { %p1347_p10 = pnand %p1345_p3, %p1305_p1 }
  0x5b   : > { %p1354_p2 = por %p1353_p13, %p1352_p9 }
  0x5c   : > { %p1348_p11 = pneg %p1347_p10 }
  0x5e   : > { %p1355_p4 = pnand %p1354_p2, %p1348_p11 }
  0x60   : > { %1358 = shalt.err (!%p1355_p4)
}
  0x61   : > { %1148 = dma.hbm_to_vmem [thread:$0]  (!%p1644_p7), %s1651_s19, 128, %s303_s3, %s292_s18  }
  0x62   : > { %311 = sbr.rel (%p1579_p8) target bundleno = 1247 (0x4df), region = 40  ;;  %s1670_s4 = sand.u32 (!%p1579_p8), 1, %s1465_s22  }
  0x63   : > { %s1673_s14 = sshll.u32 (!%p1579_p8), %s1670_s4, 3  ;;  %s314_s8 = scalar_lea.sflag (!%p1579_p8), [#allocation3], %s1670_s4 }
  0x64   : > { %s317_s11 = scalar_lea.vmem (!%p1579_p8), [#allocation2], %s1673_s14  ;;  %p1833_p1 = scmp.ne.s32.totalorder (!%p1579_p8), %s1822_s29, 0 }
  0x67   : > { %1436 = dma.done.wait (%p1833_p1), %s314_s8, 128  }
  0x68   : > { %1438 = vsyncadd (%p1833_p1), %s314_s8, 4294967168  ;;  %s322_s7 = sand.u32 1, %s1560_s27   ;;  %s326_s19 = scalar_lea.vmem [#allocation5], %s1673_s14 }
  0x69   : > { %s323_s13 = scalar_lea.sflag [#allocation6], %s322_s7 }
  0x6a   : > { %1440 = dma.done.wait (%p1833_p1), %s323_s13, 128  }
  0x6b   : > { %1442 = vsyncadd (%p1833_p1), %s323_s13, 4294967168  ;;  %p1834_p8 = scmp.eq.s32.totalorder %s1560_s27, 0 }
  0x6d   : > { %1444 = dma.done.wait (%p1834_p8), [#allocation6], 512   ;;  %p1835_p7 = pmov %p1834_p8 }
  0x6f   : > { %1446 = vsyncadd (%p1835_p7), [#allocation6], 4294966784  ;;  %p1836_p6 = pmov %p1835_p7 }
  0x71   : > { %1448 = dma.done.wait (%p1836_p6), [#allocation9], 1024   ;;  %p1837_p12 = pmov %p1836_p6 }
  0x72   : > { %v1490_v0 = vmov 0.0   ;;  %vm1491_vm0 = vmmov 0   ;;  %vm391_vm1 = vcmask 261120   ;;  %v382_v1 = vld [vmem:[#allocation7 + $0x18] sm:$0xff]  ;;  %v381_v2 = vld [vmem:[#allocation7 + $0x10] sm:$0xff]  ;;  %v380_v3 = vld [vmem:[#allocation7 + $0x8] sm:$0xff] }
  0x73   : > { %1450 = vsyncadd (%p1837_p12), [#allocation9], 4294966272  ;;  %1069 = vmatprep.subr.mxu0 %v1490_v0  ;;  %1077 = vmatprep.mubr.msk.f32.mxu0 %vm1491_vm0, %v1490_v0  ;;  %v379_v4 = vld [vmem:[#allocation7] sm:$0xff]  ;;  %v378_v6 = vld [vmem:[%s326_s19] sm:$0xff]  ;;  %vm554_vm2 = vcmask 64512   ;;  %s376_s27 = scalar_lea.vmem [#allocation12], %s1673_s14 }
  0x74   : > { %1080 = vmatprep.subr.mxu1 %v1490_v0  ;;  %1082 = vmatprep.mubr.msk.f32.mxu1 %vm1491_vm0, %v1490_v0  ;;  %v377_v5 = vld [vmem:[%s317_s11] sm:$0xff]  ;;  %v386_v18 = vld [vmem:[#allocation8 + $0x18] sm:$0xff]  ;;  %v385_v19 = vld [vmem:[#allocation8 + $0x10] sm:$0xff]  ;;  %s1046_s29 = sshll.u32 %s1473_s24, 7  ;;  %s843_s3 = sshll.u32 %s376_s27, 4  ;;  %s844_s3 = int_to_ptr.vmem [resolvable:$true] %s843_s3 }
  0x75   : > { %1070 = vmatpush3.xpose.msk.msra.mxu0 %vm391_vm1, %v382_v1  ;;  %1081 = vmatpush3.xpose.msk.msra.mxu1 %vm391_vm1, %v378_v6  ;;  %v384_v20 = vld [vmem:[#allocation8 + $0x8] sm:$0xff]  ;;  %v383_v21 = vld [vmem:[#allocation8] sm:$0xff]  ;;  %v390_v25 = vld [vmem:[#allocation10 + $0x18] sm:$0xff]  ;;  %s841_s2 = scalar_lea.hbm %s1815_s6, %s1046_s29  ;;  %s815_s18 = scalar_lea.sflag [#allocation13], %s1670_s4 }
  0x76   : > { %1071 = vmatprep.subr.mxu0 %v1490_v0  ;;  %1085 = vmatprep.subr.mxu1 %v1490_v0  ;;  %v389_v26 = vld [vmem:[#allocation10 + $0x10] sm:$0xff]  ;;  %v388_v27 = vld [vmem:[#allocation10 + $0x8] sm:$0xff]  ;;  %v387_v28 = vld [vmem:[#allocation10] sm:$0xff]  ;;  %s1359_s16 = scalar_lea.vmem %s844_s3, 128  ;;  %s1492_s28 = smov [#allocation12]  }
  0x77   : > { %p1360_p0 = scmp.ne.s32.totalorder %s844_s3, %s1359_s16  ;;  %s1363_s9 = sshll.u32 %s1492_s28, 4  ;;  %s1364_s9 = int_to_ptr.vmem [resolvable:$false] %s1363_s9 }
  0x78   : > { %s1365_s0 = scalar_lea.vmem %s1364_s9, 256  ;;  %p1366_p11 = scmp.lt.s32.totalorder %s844_s3, %s1364_s9 }
  0x79   : > { %1072 = vmatpush3.xpose.msk.msra.mxu0 %vm391_vm1, %v381_v2  ;;  %p1361_p3 = pnand %p1360_p0, %p1625_p5  ;;  %p1367_p9 = scmp.lt.s32.totalorder %s1365_s0, %s1359_s16 }
  0x7a   : > { %1073 = vmatprep.subr.mxu0 %v1490_v0 }
  0x7b   : > { %p1362_p10 = pneg %p1361_p3  ;;  %p1368_p13 = por %p1367_p9, %p1366_p11 }
  0x7d   : > { %1074 = vmatpush3.xpose.msk.msra.mxu0 %vm391_vm1, %v380_v3  ;;  %p1369_p2 = pnand %p1368_p13, %p1362_p10 }
  0x7e   : > { %1075 = vmatprep.subr.mxu0 %v1490_v0 }
  0x81   : > { %1076 = vmatpush3.xpose.msk.msra.mxu0 %vm391_vm1, %v379_v4 }
  0x82   : > { %1101 = vmatprep.subr.mxu0 %v1490_v0 }
  0x84   : > { %1078 = vmatmul.mubr.msk.f32.vlgmr.msra.gmra.mxu0 %vm391_vm1, %v377_v5 }
  0x85   : > { %1109 = vmatprep.mubr.msk.f32.mxu0 %vm1491_vm0, %v1490_v0  ;;  %1102 = vmatpush3.xpose.msk.msra.mxu0 %vm391_vm1, %v386_v18 }
  0x86   : > { %1103 = vmatprep.subr.mxu0 %v1490_v0 }
  0x89   : > { %1104 = vmatpush3.xpose.msk.msra.mxu0 %vm391_vm1, %v385_v19 }
  0x8a   : > { %1105 = vmatprep.subr.mxu0 %v1490_v0 }
  0x8d   : > { %1106 = vmatpush3.xpose.msk.msra.mxu0 %vm391_vm1, %v384_v20 }
  0x8e   : > { %1107 = vmatprep.subr.mxu0 %v1490_v0 }
  0x91   : > { %1108 = vmatpush3.xpose.msk.msra.mxu0 %vm391_vm1, %v383_v21 }
 0x144   : > { %v473_v7 = vpop.f32.mrf.mxu0 }
 0x145   : > { %v477_v8 = vmul.f32 0.17677669, %v473_v7 }
 0x146   : > { %v1079_v9 = vpop.f32.mrf.mxu0 }
 0x147   : > { %1083 = vmatmul.mubr.msk.f32.vlgmr.msra.gmra.mxu1 %vm391_vm1, %v477_v8 }
 0x148   : > { %1086 = vmatpush3.msra.mxu1 %v378_v6  ;;  %1087 = vmatprep.mubr.msk.f32.mxu1 %vm1491_vm0, %v1490_v0 }
 0x149   : > { %1090 = vmatprep.subr.mxu1 %v1490_v0 }
 0x207   : > { %v550_v10 = vpop.f32.mrf.mxu1 }
 0x208   : > { %v555_v11 = vsel %vm554_vm2, %v550_v10, -inf }
 0x209   : > { %556 = vmax.xlane.f32.xlu0 %v555_v11  ;;  %v1084_v12 = vpop.f32.mrf.mxu1 }
 0x292   : > { %v557_v13 = vpop.xlane.xlu0 %556 }
 0x293   : > { %v558_v14 = vsub.f32 %v550_v10, %v557_v13 }
 0x295   : > { %v559_v15 = vmul.f32 1.442695, %v558_v14 }
 0x297   : > { %1219 = vpow2.f32 %v559_v15 }
 0x2a4   : > { %v1220_v16 = vpop.eup %1219 }
 0x2a5   : > { %v561_v17 = vsel %vm554_vm2, %v1220_v16, 0.0 }
 0x2a6   : > { %562 = vadd.xlane.f32.xlu0 %v561_v17 }
 0x32f   : > { %v563_v22 = vpop.xlane.xlu0 %562 }
 0x330   : > { %1221 = vrcp.f32 %v563_v22 }
 0x33d   : > { %v1222_v23 = vpop.eup %1221 }
 0x33e   : > { %v565_v24 = vmul.f32 %v1222_v23, %v1220_v16 }
 0x340   : > { %1088 = vmatmul.mubr.msk.f32.vlgmr.msra.gmra.mxu1 %vm554_vm2, %v565_v24  ;;  %808 = vst.msk [vmem:[%s376_s27] sm:$0xff] %vm554_vm2, %v565_v24 }
 0x341   : > { %1091 = vmatpush3.xpose.msk.msra.mxu1 %vm391_vm1, %v390_v25  ;;  %1098 = vmatprep.mubr.msk.f32.mxu1 %vm1491_vm0, %v1490_v0 }
 0x342   : > { %1092 = vmatprep.subr.mxu1 %v1490_v0 }
 0x345   : > { %1093 = vmatpush3.xpose.msk.msra.mxu1 %vm391_vm1, %v389_v26 }
 0x346   : > { %1094 = vmatprep.subr.mxu1 %v1490_v0 }
 0x349   : > { %1095 = vmatpush3.xpose.msk.msra.mxu1 %vm391_vm1, %v388_v27 }
 0x34a   : > { %1096 = vmatprep.subr.mxu1 %v1490_v0 }
 0x34d   : > { %1097 = vmatpush3.xpose.msk.msra.mxu1 %vm391_vm1, %v387_v28 }
 0x350   : > { %1099 = vmatmul.mubr.msk.f32.vlgmr.msra.gmra.mxu1 %vm391_vm1, %v477_v8 }
 0x400   : > { %v635_v29 = vpop.f32.mrf.mxu1 }
 0x401   : > { %1110 = vmatmul.mubr.msk.f32.vlgmr.msra.gmra.mxu0 %vm391_vm1, %v635_v29 }
 0x402   : > { %v1089_v30 = vpop.f32.mrf.mxu1 }
 0x410   : > { %v717_v31 = vpop.f32.mrf.mxu1 }
 0x412   : > { %v1100_v32 = vpop.f32.mrf.mxu1 }
 0x413   : > { %1372 = shalt.err (!%p1369_p2)
}
 0x414   : > { %s1373_s8 = scalar_lea.hbm %s841_s2, 128  ;;  %s1377_s13 = scalar_lea.hbm %s1815_s6, 256 }
 0x415   : > { %p1374_p4 = scmp.ne.s32.totalorder %s841_s2, %s1373_s8  ;;  %p1378_p7 = scmp.lt.s32.totalorder %s841_s2, %s1815_s6 }
 0x416   : > { %p1379_p6 = scmp.lt.s32.totalorder %s1377_s13, %s1373_s8 }
 0x417   : > { %p1375_p1 = pnand %p1374_p4, %p1625_p5 }
 0x418   : > { %p1380_p12 = por %p1379_p6, %p1378_p7 }
 0x419   : > { %p1376_p8 = pneg %p1375_p1 }
 0x41b   : > { %p1381_p0 = pnand %p1380_p12, %p1376_p8 }
 0x41d   : > { %1384 = shalt.err (!%p1381_p0)
}
 0x41e   : > { %1129 = dma.vmem_to_hbm [thread:$0]  (%p1625_p5), %s844_s3, 128, %s841_s2, %s815_s18  }
 0x41f   : > { %s369_s12 = scalar_lea.vmem [#allocation11], %s1673_s14  ;;  %s1766_s9 = scalar_lea.hbm %s1814_s5, %s1046_s29 }
 0x420   : > { %s829_s20 = sshll.u32 %s369_s12, 4  ;;  %s810_s0 = scalar_lea.sflag [#allocation4], %s1670_s4  ;;  %s830_s20 = int_to_ptr.vmem [resolvable:$true] %s829_s20 }
 0x421   : > { %s1385_s8 = scalar_lea.vmem %s830_s20, 128  ;;  %s1493_s2 = smov [#allocation11]  }
 0x422   : > { %p1386_p3 = scmp.ne.s32.totalorder %s830_s20, %s1385_s8  ;;  %s1389_s3 = sshll.u32 %s1493_s2, 4  ;;  %s1390_s3 = int_to_ptr.vmem [resolvable:$false] %s1389_s3 }
 0x423   : > { %s1391_s14 = scalar_lea.vmem %s1390_s3, 256  ;;  %p1392_p9 = scmp.lt.s32.totalorder %s830_s20, %s1390_s3 }
 0x424   : > { %p1387_p10 = pnand %p1386_p3, %p1625_p5  ;;  %p1393_p13 = scmp.lt.s32.totalorder %s1391_s14, %s1385_s8 }
 0x426   : > { %p1388_p11 = pneg %p1387_p10  ;;  %p1394_p2 = por %p1393_p13, %p1392_p9 }
 0x428   : > { %p1395_p4 = pnand %p1394_p2, %p1388_p11 }
 0x4c1   : > { %v802_v33 = vpop.f32.mrf.mxu0 }
 0x4c2   : > { %v803_v34 = vadd.f32 %v802_v33, %v717_v31 }
 0x4c3   : > { %v1111_v35 = vpop.f32.mrf.mxu0 }
 0x4c4   : > { %1223 = vtanh.f32 %v803_v34 }
 0x4d1   : > { %v1224_v36 = vpop.eup %1223 }
 0x4d2   : > { %807 = vst.msk [vmem:[%s369_s12] sm:$0xff] %vm391_vm1, %v1224_v36 }
 0x4d3   : > { %1398 = shalt.err (!%p1395_p4)
}
 0x4d4   : > { %s1399_s24 = scalar_lea.hbm %s1766_s9, 128  ;;  %s1403_s18 = scalar_lea.hbm %s1814_s5, 256 }
 0x4d5   : > { %p1400_p1 = scmp.ne.s32.totalorder %s1766_s9, %s1399_s24  ;;  %p1404_p6 = scmp.lt.s32.totalorder %s1766_s9, %s1814_s5 }
 0x4d6   : > { %p1405_p12 = scmp.lt.s32.totalorder %s1403_s18, %s1399_s24 }
 0x4d7   : > { %p1401_p8 = pnand %p1400_p1, %p1625_p5 }
 0x4d8   : > { %p1406_p0 = por %p1405_p12, %p1404_p6 }
 0x4d9   : > { %p1402_p7 = pneg %p1401_p8 }
 0x4db   : > { %p1407_p3 = pnand %p1406_p0, %p1402_p7 }
 0x4dd   : > { %1410 = shalt.err (!%p1407_p3)
}
 0x4de   : > { %1128 = dma.vmem_to_hbm [thread:$0]  (%p1625_p5), %s830_s20, 128, %s1766_s9, %s810_s0  }
 0x4df PF: > { %s855_s13 = sand.u32 1, %s1461_s21   ;;  %p1838_p10 = scmp.ne.s32.totalorder %s1823_s30, 0 }
 0x4e0   : > { %p1839_p11 = scmp.ge.s32.totalorder %s1481_s26, 2  ;;  %s856_s19 = scalar_lea.sflag [#allocation4], %s855_s13 }
 0x4e2   : > { %p1150_p9 = pnand %p1839_p11, %p1838_p10 }
 0x4e4   : > { %p1151_p13 = pneg %p1150_p9 }
 0x4e6   : > { %1452 = dma.done.wait (%p1151_p13), %s856_s19, 128  }
 0x4e7   : > { %1454 = vsyncadd (%p1151_p13), %s856_s19, 4294967168  ;;  %s865_s27 = scalar_lea.sflag [#allocation13], %s855_s13 }
 0x4e8   : > { %1456 = dma.done.wait (%p1151_p13), %s865_s27, 128  }
 0x4e9   : > { %1458 = vsyncadd (%p1151_p13), %s865_s27, 4294967168  ;;  %s30_s26 = sadd.s32 1, %s1481_s26   ;;  %s1840_s21 = smov %s1465_s22 }
 0x4ea   : > { %p27_p2 = scmp.ge.s32.totalorder %s30_s26, 4   ;;  %s1841_s22 = smov %s1469_s23 }
 0x4eb   : > { %s1842_s23 = smov %s1637_s17  ;;  %s1843_s24 = smov %s1477_s25 }
 0x4ec   : > { %s1844_s25 = smov %s1846_s15  ;;  %29 = sbr.rel (!%p27_p2) target bundleno = 16 (0x10), region = 127 }
 0x4f1   :  { %870 = vsyncpa [#allocation3], 1 }
 0x4f2   :  { %872 = vsyncpa [#allocation3 + $0x1], 1 }
 0x4f3   :  { %873 = vsyncpa [#allocation6], 1 }
 0x4f4   :  { %875 = vsyncpa [#allocation6 + $0x1], 1 }
 0x4f5   :  { %876 = vsyncpa [#allocation9], 1 }
 0x4f6   :  { %877 = vsyncpa [#allocation4], 1 }
 0x4f7   :  { %879 = vsyncpa [#allocation4 + $0x1], 1 }
 0x4f8   :  { %880 = vsyncpa [#allocation13], 1 }
 0x4f9   :  { %882 = vsyncpa [#allocation13 + $0x1], 1 }

</bundles_post_ra>
